<compile_context>
chip_gen: v6e
topology: v6e:2x2x1
jax: 0.10.0
libtpu: 0.0.40
codegen_flags: <defaults>
</compile_context>

<pallas_src>
import jax
import jax.numpy as jnp
from jax.experimental import pallas as pl
from jax.experimental.pallas import tpu as pltpu  # used by full-size TODO variant

# ----------------------- small, module-consistent config ---------------------
NUM_TASK = 2          # config['num_task']
WAY      = 4          # config['way_number']
SHOT     = 2          # config['shot_number']
QUERY    = 2          # per-way query samples (per_way - shot)
PER_WAY  = SHOT + QUERY
D        = 128        # d_feature (small stand-in for 4096 / 512)
A_REPEAT = 2          # config['a_repeat']
W_REPEAT = 2          # config['w_repeat']
R        = A_REPEAT * W_REPEAT        # repeats per task, r = wr*A_REPEAT + a
NQ       = WAY * QUERY                # query rows per task
TA       = NUM_TASK * A_REPEAT        # (task, a_repeat) rows
AW       = A_REPEAT * WAY


# ------------------------------- in-kernel helpers ----------------------------
def _to_sigma(raw):
    return 0.1 + 0.9 * jax.nn.sigmoid(raw)     # strictly positive scale


def _kl_normal(qmu, qsig, pmu, psig):
    return (jnp.log(psig / qsig)
            + (qsig * qsig + (qmu - pmu) ** 2) / (2.0 * psig * psig) - 0.5)


# --------------------------------- kernels -----------------------------------
def mtnp_eval_kernel(task_prior_ref, xc_way_ref, eps_a_ref, preds_ref,
                     wa_ref, ba_ref, wpmu_ref, bpmu_ref, out_ref):
    """Single-invocation fused eval path.

    task_prior: (T, WAY*SHOT, D)   xc_way: (WAY, T*SHOT, D)
    eps_a:      (T, A, D)          preds:  (T, NQ, D)
    wa: (D, 2D)  ba: (1, 2D)       wpmu: (D, D)  bpmu: (1, D)
    out: (T, A, NQ, WAY)
    """
    T, A, W = NUM_TASK, A_REPEAT, WAY

    # alpha prior encoder: all tasks batched into one (T, D) @ (D, 2D) push
    h = jnp.mean(task_prior_ref[...], axis=1)                               # (T, D)
    a_out = jnp.dot(h, wa_ref[...], preferred_element_type=jnp.float32) + ba_ref[...]
    a_mu, a_sig = a_out[:, :D], _to_sigma(a_out[:, D:])
    # prior rsample -> task embeddings, rows ordered (t, a)
    te = (a_mu[:, None, :] + a_sig[:, None, :] * eps_a_ref[...]).reshape(T * A, D)

    # phi_mu via linearity of the pre-activation: only (W + T*A) rows hit W_mu
    c_all = jnp.mean(xc_way_ref[...], axis=1)                               # (W, D)
    rows = jnp.concatenate([c_all, te], axis=0)                             # (W+T*A, D)
    mu_rows = jnp.dot(rows, wpmu_ref[...], preferred_element_type=jnp.float32)
    ctx_mu = mu_rows[:W] + bpmu_ref[...]                                    # (W, D)
    te_mu = mu_rows[W:]                                                     # (T*A, D)
    phi_mu = ctx_mu[None, :, :] + te_mu[:, None, :]                         # (T*A, W, D)

    # collapsed classifier (eval uses phi_mu only), batched over (t, a)
    preds_b = jnp.broadcast_to(preds_ref[...][:, None],
                               (T, A, NQ, D)).reshape(T * A, NQ, D)
    logits = jnp.einsum('bqd,bwd->bqw', preds_b, phi_mu,
                        preferred_element_type=jnp.float32)                  # (T*A, NQ, W)
    out_ref[...] = logits.reshape(T, A, NQ, W)


def mtnp_train_kernel(task_prior_ref, task_post_ref, xc_way_ref, xt_way_ref,
                      preds_ref, eps_a_ref, eps_q_ref, eps_p_ref,
                      wa_ref, ba_ref, wp_ref, bp_ref,
                      out_q_ref, out_p_ref, kl_a_ref, kl_w_ref):
    """Single-invocation fused training path.

    task_prior/post: (T, WAY*SHOT|WAY*QUERY, D)
    xc_way/xt_way:   (WAY, T*SHOT|T*QUERY, D)
    preds: (T, NQ, D)  eps_a: (T, A, D)  eps_q/eps_p: (T, WR, A, WAY, D)
    wa/wp: (D, 2D)  ba/bp: (1, 2D)
    out_q/out_p: (T, R, NQ, WAY)  (r = wr*A + a, torch ordering)
    kl_a/kl_w:   (T, D) lane-dense partials (wrapper sums over D)
    """
    T, A, W, WR = NUM_TASK, A_REPEAT, WAY, W_REPEAT

    # ---- alpha encoder: prior + posterior pooled rows in ONE (2T,D)@(D,2D) push
    h = jnp.concatenate([jnp.mean(task_prior_ref[...], axis=1),
                         jnp.mean(task_post_ref[...], axis=1)], axis=0)     # (2T, D)
    a_out = jnp.dot(h, wa_ref[...], preferred_element_type=jnp.float32) + ba_ref[...]
    a_pmu, a_psig = a_out[:T, :D], _to_sigma(a_out[:T, D:])
    a_qmu, a_qsig = a_out[T:, :D], _to_sigma(a_out[T:, D:])
    kl_a_ref[...] = _kl_normal(a_qmu, a_qsig, a_pmu, a_psig)                # (T, D)

    # ---- a_qsample rows (t, a) used as task embeddings
    te = (a_qmu[:, None, :] + a_qsig[:, None, :] * eps_a_ref[...]).reshape(T * A, D)

    # ---- phi stats via pre-activation linearity:
    #      class-ctx rows (prior + posterior) and te rows share one MXU push
    lhs = jnp.concatenate([jnp.mean(xc_way_ref[...], axis=1),
                           jnp.mean(xt_way_ref[...], axis=1), te], axis=0)  # (2W+TA, D)
    ph = jnp.dot(lhs, wp_ref[...], preferred_element_type=jnp.float32)
    ctx_p = ph[:W] + bp_ref[...]                                            # (W, 2D)
    ctx_q = ph[W:2 * W] + bp_ref[...]                                       # (W, 2D)
    te_ph = ph[2 * W:]                                                      # (T*A, 2D)

    raw_p = ctx_p[None, :, :] + te_ph[:, None, :]                           # (T*A, W, 2D)
    raw_q = ctx_q[None, :, :] + te_ph[:, None, :]
    p_mu, p_sig = raw_p[..., :D], _to_sigma(raw_p[..., D:])                 # (T*A, W, D)
    q_mu, q_sig = raw_q[..., :D], _to_sigma(raw_q[..., D:])

    kl_w = _kl_normal(q_mu, q_sig, p_mu, p_sig)                             # (T*A, W, D)
    kl_w_ref[...] = jnp.sum(kl_w.reshape(T, A, W, D), axis=(1, 2)) * (1.0 / W)

    # ---- sample w_repeat classifiers and classify, all in VMEM -----------
    # output row r = wr*A + a (matches torch's reshape ordering); everything
    # stays rank<=4 and all reshapes only split/merge leading dims.
    mu_q4, sg_q4 = q_mu.reshape(T, A, W, D), q_sig.reshape(T, A, W, D)
    mu_p4, sg_p4 = p_mu.reshape(T, A, W, D), p_sig.reshape(T, A, W, D)
    preds_a = jnp.broadcast_to(preds_ref[...][:, None],
                               (T, A, NQ, D)).reshape(T * A, NQ, D)
    eps_q = eps_q_ref[...]
    eps_p = eps_p_ref[...]
    for wr in range(WR):                                   # static unroll (WR small)
        cls_q = (mu_q4 + sg_q4 * eps_q[:, wr]).reshape(T * A, W, D)
        cls_p = (mu_p4 + sg_p4 * eps_p[:, wr]).reshape(T * A, W, D)
        lq = jnp.einsum('bqd,bwd->bqw', preds_a, cls_q,
                        preferred_element_type=jnp.float32).reshape(T, A, NQ, W)
        lp = jnp.einsum('bqd,bwd->bqw', preds_a, cls_p,
                        preferred_element_type=jnp.float32).reshape(T, A, NQ, W)
        out_q_ref[:, wr * A:(wr + 1) * A] = lq
        out_p_ref[:, wr * A:(wr + 1) * A] = lp


# --------------------------------- parameters ---------------------------------
def init_params(key):
    ks = jax.random.split(key, 8)
    s = 0.05

    def concat_lin(kwm, kbm, kws, kbs):
        w = jnp.concatenate([jax.random.normal(kwm, (D, D), jnp.float32),
                             jax.random.normal(kws, (D, D), jnp.float32)], axis=1) * s
        b = jnp.concatenate([jax.random.normal(kbm, (1, D), jnp.float32),
                             jax.random.normal(kbs, (1, D), jnp.float32)], axis=1) * s
        return w, b                       # (D, 2D) = [W_mu | W_sigma], (1, 2D)

    return {"alpha": concat_lin(ks[0], ks[1], ks[2], ks[3]),
            "phi":   concat_lin(ks[4], ks[5], ks[6], ks[7])}


# --------------------------------- forward ------------------------------------
def _forward(params, inputs_batch, labels_batch, key, training=False):
    # ----- ordering by label (matches torch: indices from task 0 only) -----
    label_all = labels_batch[..., 0]                          # (T, W, P)
    indices = jnp.argsort(label_all[0, :, 0])
    x_c = inputs_batch[:, :, :SHOT, :]                        # (T, W, S, D)
    x_t = inputs_batch[:, :, SHOT:, :]                        # (T, W, Q, D)
    x_c_order = x_c[:, indices]
    x_t_order = x_t[:, indices]

    task_prior = x_c_order.reshape(NUM_TASK, WAY * SHOT, D)
    # class context is shared across tasks (torch passes the full x_c_order to
    # the phi encoder inside the per-task loop)
    xc_way = jnp.transpose(x_c_order, (1, 0, 2, 3)).reshape(WAY, NUM_TASK * SHOT, D)
    preds = x_t.reshape(NUM_TASK, NQ, D)                      # un-ordered, as in torch

    wa, ba = params["alpha"]
    wp, bp = params["phi"]
    k_ap, k_aq, k_cls = jax.random.split(key, 3)

    if not training:
        # ---------------- eval: one fused pallas_call ----------------
        eps_a = jax.random.normal(k_ap, (NUM_TASK, A_REPEAT, D), jnp.float32)
        logits = pl.pallas_call(
            mtnp_eval_kernel,
            out_shape=jax.ShapeDtypeStruct(
                (NUM_TASK, A_REPEAT, NQ, WAY), jnp.float32),
        )(task_prior, xc_way, eps_a, preds, wa, ba, wp[:, :D], bp[:, :D])
        # eval classifier is deterministic in w_repeat -> pure broadcast
        out = jnp.broadcast_to(logits[:, None],
                               (NUM_TASK, W_REPEAT, A_REPEAT, NQ, WAY))
        return out.reshape(NUM_TASK, R, NQ, WAY)

    # ---------------- training: one fused pallas_call ----------------
    task_post = x_t_order.reshape(NUM_TASK, WAY * QUERY, D)
    xt_way = jnp.transpose(x_t_order, (1, 0, 2, 3)).reshape(WAY, NUM_TASK * QUERY, D)
    eps_a = jax.random.normal(k_aq, (NUM_TASK, A_REPEAT, D), jnp.float32)
    eps_cls = jax.random.normal(
        k_cls, (2, NUM_TASK, W_REPEAT, A_REPEAT, WAY, D), jnp.float32)

    out_q, out_p, kl_a_part, kl_w_part = pl.pallas_call(
        mtnp_train_kernel,
        out_shape=(
            jax.ShapeDtypeStruct((NUM_TASK, R, NQ, WAY), jnp.float32),
            jax.ShapeDtypeStruct((NUM_TASK, R, NQ, WAY), jnp.float32),
            jax.ShapeDtypeStruct((NUM_TASK, D), jnp.float32),
            jax.ShapeDtypeStruct((NUM_TASK, D), jnp.float32),
        ),
    )(task_prior, task_post, xc_way, xt_way, preds, eps_a,
      eps_cls[0], eps_cls[1], wa, ba, wp, bp)

    kl_a = kl_a_part.sum(axis=-1)                             # (T,)
    kl_w = kl_w_part.sum(axis=-1)                             # (T,) (already /WAY)
    return out_q, out_p, kl_a, kl_w


mtnp_forward = jax.jit(_forward, static_argnames=("training",))


# ----------------------------------- main --------------------------------------
if __name__ == "__main__":
    key = jax.random.PRNGKey(0)
    k_param, k_x, k_lbl, k_s1, k_s2 = jax.random.split(key, 5)

    params = init_params(k_param)
    inputs_batch = jax.random.normal(
        k_x, (NUM_TASK, WAY, PER_WAY, D), jnp.float32)
    perm = jax.random.permutation(k_lbl, WAY).astype(jnp.float32)
    labels_batch = jnp.broadcast_to(
        perm[None, :, None, None], (NUM_TASK, WAY, PER_WAY, 1))

    # eval path (what torch MTNP.forward returns in eval mode)
    out_eval = mtnp_forward(params, inputs_batch, labels_batch, k_s1, training=False)
    out_eval = jax.block_until_ready(out_eval)
    assert out_eval.shape == (NUM_TASK, R, NQ, WAY), out_eval.shape
    assert bool(jnp.all(jnp.isfinite(out_eval)))

    # training path (posterior/prior logits + KL terms), fully fused
    out_q, out_p, kl_a, kl_w = mtnp_forward(
        params, inputs_batch, labels_batch, k_s2, training=True)
    jax.block_until_ready((out_q, out_p, kl_a, kl_w))
    assert out_q.shape == (NUM_TASK, R, NQ, WAY), out_q.shape
    assert out_p.shape == (NUM_TASK, R, NQ, WAY), out_p.shape
    assert kl_a.shape == (NUM_TASK,) and kl_w.shape == (NUM_TASK,)

    print("KERNEL_OK")
</pallas_src>

<mosaic_0001>
module attributes {stable_mosaic.version = 11 : i64} {
  func.func @mtnp_eval_kernel(%arg0: memref<2x8x128xf32, #tpu.memory_space<vmem>>, %arg1: memref<4x4x128xf32, #tpu.memory_space<vmem>>, %arg2: memref<2x2x128xf32, #tpu.memory_space<vmem>>, %arg3: memref<2x8x128xf32, #tpu.memory_space<vmem>>, %arg4: memref<128x256xf32, #tpu.memory_space<vmem>>, %arg5: memref<1x256xf32, #tpu.memory_space<vmem>>, %arg6: memref<128x128xf32, #tpu.memory_space<vmem>>, %arg7: memref<1x128xf32, #tpu.memory_space<vmem>>, %arg8: memref<2x2x8x4xf32, #tpu.memory_space<vmem>>) attributes {dimension_semantics = [], scalar_prefetch = 0 : i64, scratch_operands = 0 : i64, tpu.core_type = #tpu.core_type<tc>} {
    %c0 = arith.constant 0 : index
    %c0_0 = arith.constant 0 : index
    %c0_1 = arith.constant 0 : index
    %0 = vector.load %arg0[%c0, %c0_0, %c0_1] : memref<2x8x128xf32, #tpu.memory_space<vmem>>, vector<2x8x128xf32>
    %cst = arith.constant dense<0.000000e+00> : vector<2x128xf32>
    %1 = vector.multi_reduction <add>, %0, %cst [1] : vector<2x8x128xf32> to vector<2x128xf32>
    %cst_2 = arith.constant 8.000000e+00 : f32
    %2 = vector.broadcast %cst_2 : f32 to vector<2x128xf32>
    %3 = arith.divf %1, %2 : vector<2x128xf32>
    %c0_3 = arith.constant 0 : index
    %c0_4 = arith.constant 0 : index
    %4 = vector.load %arg4[%c0_3, %c0_4] : memref<128x256xf32, #tpu.memory_space<vmem>>, vector<128x256xf32>
    %cst_5 = arith.constant dense<0.000000e+00> : vector<2x256xf32>
    %5 = tpu.matmul %3, %4, %cst_5 {dimension_numbers = #tpu.dot_dimension_numbers<[1], [0], [0], [1], [0, 0, 1, 1], [], []>} : vector<2x128xf32>, vector<128x256xf32>, vector<2x256xf32> -> vector<2x256xf32>
    %c0_6 = arith.constant 0 : index
    %c0_7 = arith.constant 0 : index
    %6 = vector.load %arg5[%c0_6, %c0_7] : memref<1x256xf32, #tpu.memory_space<vmem>>, vector<1x256xf32>
    %7 = vector.broadcast %6 : vector<1x256xf32> to vector<2x256xf32>
    %8 = arith.addf %5, %7 : vector<2x256xf32>
    %9 = vector.extract_strided_slice %8 {offsets = [0, 0], sizes = [2, 128], strides = [1, 1]} : vector<2x256xf32> to vector<2x128xf32>
    %10 = vector.extract_strided_slice %8 {offsets = [0, 128], sizes = [2, 128], strides = [1, 1]} : vector<2x256xf32> to vector<2x128xf32>
    %11 = arith.negf %10 : vector<2x128xf32>
    %12 = math.exp %11 : vector<2x128xf32>
    %cst_8 = arith.constant 1.000000e+00 : f32
    %13 = vector.broadcast %cst_8 : f32 to vector<2x128xf32>
    %14 = arith.addf %13, %12 : vector<2x128xf32>
    %15 = arith.divf %13, %14 : vector<2x128xf32>
    %cst_9 = arith.constant 0.899999976 : f32
    %16 = vector.broadcast %cst_9 : f32 to vector<2x128xf32>
    %17 = arith.mulf %16, %15 : vector<2x128xf32>
    %cst_10 = arith.constant 1.000000e-01 : f32
    %18 = vector.broadcast %cst_10 : f32 to vector<2x128xf32>
    %19 = arith.addf %18, %17 : vector<2x128xf32>
    %20 = vector.shape_cast %9 : vector<2x128xf32> to vector<2x1x128xf32>
    %21 = vector.shape_cast %19 : vector<2x128xf32> to vector<2x1x128xf32>
    %c0_11 = arith.constant 0 : index
    %c0_12 = arith.constant 0 : index
    %c0_13 = arith.constant 0 : index
    %22 = vector.load %arg2[%c0_11, %c0_12, %c0_13] : memref<2x2x128xf32, #tpu.memory_space<vmem>>, vector<2x2x128xf32>
    %23 = vector.broadcast %21 : vector<2x1x128xf32> to vector<2x2x128xf32>
    %24 = arith.mulf %23, %22 : vector<2x2x128xf32>
    %25 = vector.broadcast %20 : vector<2x1x128xf32> to vector<2x2x128xf32>
    %26 = arith.addf %25, %24 : vector<2x2x128xf32>
    %27 = vector.shape_cast %26 : vector<2x2x128xf32> to vector<4x128xf32>
    %c0_14 = arith.constant 0 : index
    %c0_15 = arith.constant 0 : index
    %c0_16 = arith.constant 0 : index
    %28 = vector.load %arg1[%c0_14, %c0_15, %c0_16] : memref<4x4x128xf32, #tpu.memory_space<vmem>>, vector<4x4x128xf32>
    %cst_17 = arith.constant dense<0.000000e+00> : vector<4x128xf32>
    %29 = vector.multi_reduction <add>, %28, %cst_17 [1] : vector<4x4x128xf32> to vector<4x128xf32>
    %cst_18 = arith.constant 4.000000e+00 : f32
    %30 = vector.broadcast %cst_18 : f32 to vector<4x128xf32>
    %31 = arith.divf %29, %30 : vector<4x128xf32>
    %32 = tpu.concatenate %31, %27 in 0 : vector<4x128xf32>, vector<4x128xf32> -> vector<8x128xf32>
    %c0_19 = arith.constant 0 : index
    %c0_20 = arith.constant 0 : index
    %33 = vector.load %arg6[%c0_19, %c0_20] : memref<128x128xf32, #tpu.memory_space<vmem>>, vector<128x128xf32>
    %cst_21 = arith.constant dense<0.000000e+00> : vector<8x128xf32>
    %34 = tpu.matmul %32, %33, %cst_21 {dimension_numbers = #tpu.dot_dimension_numbers<[1], [0], [0], [1], [0, 0, 1, 1], [], []>} : vector<8x128xf32>, vector<128x128xf32>, vector<8x128xf32> -> vector<8x128xf32>
    %35 = vector.extract_strided_slice %34 {offsets = [0, 0], sizes = [4, 128], strides = [1, 1]} : vector<8x128xf32> to vector<4x128xf32>
    %c0_22 = arith.constant 0 : index
    %c0_23 = arith.constant 0 : index
    %36 = vector.load %arg7[%c0_22, %c0_23] : memref<1x128xf32, #tpu.memory_space<vmem>>, vector<1x128xf32>
    %37 = vector.broadcast %36 : vector<1x128xf32> to vector<4x128xf32>
    %38 = arith.addf %35, %37 : vector<4x128xf32>
    %39 = vector.extract_strided_slice %34 {offsets = [4, 0], sizes = [4, 128], strides = [1, 1]} : vector<8x128xf32> to vector<4x128xf32>
    %40 = vector.shape_cast %38 : vector<4x128xf32> to vector<1x4x128xf32>
    %41 = vector.shape_cast %39 : vector<4x128xf32> to vector<4x1x128xf32>
    %42 = vector.broadcast %40 : vector<1x4x128xf32> to vector<4x4x128xf32>
    %43 = vector.broadcast %41 : vector<4x1x128xf32> to vector<4x4x128xf32>
    %44 = arith.addf %42, %43 : vector<4x4x128xf32>
    %c0_24 = arith.constant 0 : index
    %c0_25 = arith.constant 0 : index
    %c0_26 = arith.constant 0 : index
    %45 = vector.load %arg3[%c0_24, %c0_25, %c0_26] : memref<2x8x128xf32, #tpu.memory_space<vmem>>, vector<2x8x128xf32>
    %46 = vector.shape_cast %45 : vector<2x8x128xf32> to vector<2x1x8x128xf32>
    %47 = vector.shape_cast %46 : vector<2x1x8x128xf32> to vector<2x1x8x128xf32>
    %48 = vector.broadcast %47 : vector<2x1x8x128xf32> to vector<2x2x8x128xf32>
    %49 = vector.shape_cast %48 : vector<2x2x8x128xf32> to vector<4x8x128xf32>
    "tpu.trace_start"() <{level = 10 : i32, message = "bqd,bwd->bqw"}> : () -> ()
    %cst_27 = arith.constant dense<0.000000e+00> : vector<4x8x4xf32>
    %50 = tpu.matmul %49, %44, %cst_27 {dimension_numbers = #tpu.dot_dimension_numbers<[2], [2], [1], [1], [0, 0, 0, 1, 1, 1], [0], [0]>} : vector<4x8x128xf32>, vector<4x4x128xf32>, vector<4x8x4xf32> -> vector<4x8x4xf32>
    "tpu.trace_stop"() : () -> ()
    %51 = vector.shape_cast %50 : vector<4x8x4xf32> to vector<2x2x8x4xf32>
    %c0_28 = arith.constant 0 : index
    %c0_29 = arith.constant 0 : index
    %c0_30 = arith.constant 0 : index
    %c0_31 = arith.constant 0 : index
    %52 = vector.load %arg8[%c0_28, %c0_29, %c0_30, %c0_31] : memref<2x2x8x4xf32, #tpu.memory_space<vmem>>, vector<2x2x8x4xf32>
    tpu.vector_store %arg8[%c0_28, %c0_29, %c0_30, %c0_31], %51 {strides = array<i32>} : memref<2x2x8x4xf32, #tpu.memory_space<vmem>>, vector<2x2x8x4xf32>,
    return
  }
}

</mosaic_0001>

<bundles_post_ra>
// kernel: _forward.3
= control target key start
LH: loop header
LB: loop body
LE: loop exit
PB: predicated region body
PF: predicated region fallthrough
CT: control target
= control target key end

     0   :  { %v832_v3 = vmov 0.0   ;;  %vm92_vm0 = vcmask 1041409   ;;  %vm833_vm1 = vmmov 0   ;;  %vm250_vm2 = vcmask 1043456   ;;  %s1139_s4 = inlined_call_operand.vmem [shape: f32[128,256], index: 4, kind: input, shape index: {}]   ;;  %s1140_s0 = inlined_call_operand.vmem [shape: f32[2,8,128], index: 0, kind: input, shape index: {}]   ;;  %s1141_s6 = inlined_call_operand.vmem [shape: f32[128,128], index: 6, kind: input, shape index: {}]   ;;  %s1142_s5 = inlined_call_operand.vmem [shape: f32[1,256], index: 5, kind: input, shape index: {}]   ;;  %s1143_s1 = inlined_call_operand.vmem [shape: f32[4,4,128], index: 1, kind: input, shape index: {}]   ;;  %s1144_s2 = inlined_call_operand.vmem [shape: f32[2,2,128], index: 2, kind: input, shape index: {}]   ;;  %s1145_s7 = inlined_call_operand.vmem [shape: f32[1,128], index: 7, kind: input, shape index: {}]   ;;  %s1146_s3 = inlined_call_operand.vmem [shape: f32[2,8,128], index: 3, kind: input, shape index: {}]   ;;  %s1147_s8 = inlined_call_operand.vmem [shape: f32[2,2,8,4], index: 8, kind: output, shape index: {}]  }
   0x1   :  { %v77_v0 = vld [vmem:[%s1139_s4 + $0xf8] sm:$0xff]  ;;  %v76_v1 = vld [vmem:[%s1139_s4 + $0xf0] sm:$0xff]  ;;  %v75_v2 = vld [vmem:[%s1139_s4 + $0xe8] sm:$0xff]  ;;  %159 = vmatprep.mubr.f32.mxu0 %v832_v3  ;;  %769 = vmatprep.subr.mxu1 %v832_v3  ;;  %vm289_vm3 = vcmask 1042434   ;;  %vm291_vm4 = vcmask 1043459   ;;  %vm733_vm5 = vcmask 31744  }
   0x2   :  { %95 = vmatprep.subr.mxu0 %v77_v0  ;;  %v74_v4 = vld [vmem:[%s1139_s4 + $0xe0] sm:$0xff]  ;;  %v73_v5 = vld [vmem:[%s1139_s4 + $0xd8] sm:$0xff]  ;;  %v72_v6 = vld [vmem:[%s1139_s4 + $0xd0] sm:$0xff]  ;;  %801 = vmatprep.mubr.msk.f32.mxu1 %vm833_vm1, %v832_v3 }
   0x3   :  { %96 = vmatpush1.msra.mxu0 %v76_v1  ;;  %v71_v7 = vld [vmem:[%s1139_s4 + $0xc8] sm:$0xff]  ;;  %v70_v8 = vld [vmem:[%s1139_s4 + $0xc0] sm:$0xff]  ;;  %v69_v9 = vld [vmem:[%s1139_s4 + $0xb8] sm:$0xff] }
   0x4   :  { %97 = vmatprep.subr.mxu0 %v75_v2  ;;  %v68_v10 = vld [vmem:[%s1139_s4 + $0xb0] sm:$0xff]  ;;  %v67_v11 = vld [vmem:[%s1139_s4 + $0xa8] sm:$0xff]  ;;  %v66_v12 = vld [vmem:[%s1139_s4 + $0xa0] sm:$0xff]  ;;  %v80_v2 = vlaneseq }
   0x5   :  { %98 = vmatpush1.msra.mxu0 %v74_v4  ;;  %v65_v13 = vld [vmem:[%s1139_s4 + $0x98] sm:$0xff]  ;;  %v29_v14 = vld [vmem:[%s1140_s0] sm:$0xff]  ;;  %v64_v15 = vld [vmem:[%s1139_s4 + $0x90] sm:$0xff] }
   0x6   :  { %99 = vmatprep.subr.mxu0 %v73_v5  ;;  %v30_v16 = vld [vmem:[%s1140_s0 + $0x8] sm:$0xff]  ;;  %v31_v17 = vrot.slane %v29_v14, 4  ;;  %v62_v20 = vld [vmem:[%s1139_s4 + $0x80] sm:$0xff]  ;;  %v61_v22 = vld [vmem:[%s1139_s4 + $0x78] sm:$0xff]  ;;  %v1055_v4 = vshrl.u32 %v80_v2, 7 }
   0x7   :  { %100 = vmatpush1.msra.mxu0 %v72_v6  ;;  %v63_v18 = vld [vmem:[%s1139_s4 + $0x88] sm:$0xff]  ;;  %v37_v19 = vrot.slane %v30_v16, 4  ;;  %v60_v24 = vld [vmem:[%s1139_s4 + $0x70] sm:$0xff]  ;;  %v58_v28 = vld [vmem:[%s1139_s4 + $0x60] sm:$0xff] }
   0x8   :  { %101 = vmatprep.subr.mxu0 %v71_v7  ;;  %v32_v21 = vadd.f32 %v31_v17, %v29_v14  ;;  %v59_v26 = vld [vmem:[%s1139_s4 + $0x68] sm:$0xff]  ;;  %v57_v30 = vld [vmem:[%s1139_s4 + $0x58] sm:$0xff]  ;;  %v56_v32 = vld [vmem:[%s1139_s4 + $0x50] sm:$0xff]  ;;  %v86_v5 = vsub.s32 1, %v1055_v4 }
   0x9   :  { %102 = vmatpush1.msra.mxu0 %v70_v8  ;;  %v38_v23 = vadd.f32 %v37_v19, %v30_v16  ;;  %v55_v34 = vld [vmem:[%s1139_s4 + $0x48] sm:$0xff]  ;;  %v54_v36 = vld [vmem:[%s1139_s4 + $0x40] sm:$0xff]  ;;  %v53_v37 = vld [vmem:[%s1139_s4 + $0x38] sm:$0xff] }
   0xa   :  { %103 = vmatprep.subr.mxu0 %v69_v9  ;;  %v33_v25 = vrot.slane %v32_v21, 2  ;;  %v52_v40 = vld [vmem:[%s1139_s4 + $0x30] sm:$0xff]  ;;  %v51_v41 = vld [vmem:[%s1139_s4 + $0x28] sm:$0xff]  ;;  %v50_v42 = vld [vmem:[%s1139_s4 + $0x20] sm:$0xff] }
   0xb   :  { %104 = vmatpush1.msra.mxu0 %v68_v10  ;;  %v39_v27 = vrot.slane %v38_v23, 2  ;;  %v49_v43 = vld [vmem:[%s1139_s4 + $0x18] sm:$0xff]  ;;  %v48_v46 = vld [vmem:[%s1139_s4 + $0x10] sm:$0xff]  ;;  %v47_v47 = vld [vmem:[%s1139_s4 + $0x8] sm:$0xff] }
   0xc   :  { %105 = vmatprep.subr.mxu0 %v67_v11  ;;  %v34_v29 = vadd.f32 %v33_v25, %v32_v21  ;;  %v46_v48 = vld [vmem:[%s1139_s4] sm:$0xff]  ;;  %v322_v50 = vld [vmem:[%s1141_s6 + $0x78] sm:$0xff]  ;;  %v321_v51 = vld [vmem:[%s1141_s6 + $0x70] sm:$0xff]  ;;  %v834_v25 = vmov 1966171168  }
   0xd   :  { %106 = vmatpush1.msra.mxu0 %v66_v12  ;;  %v40_v31 = vadd.f32 %v39_v27, %v38_v23  ;;  %770 = vmatpush3.msra.mxu1 %v322_v50  ;;  %v320_v52 = vld [vmem:[%s1141_s6 + $0x68] sm:$0xff]  ;;  %v319_v53 = vld [vmem:[%s1141_s6 + $0x60] sm:$0xff]  ;;  %v318_v54 = vld [vmem:[%s1141_s6 + $0x58] sm:$0xff] }
   0xe   :  { %107 = vmatprep.subr.mxu0 %v65_v13  ;;  %v35_v33 = vrot.slane %v34_v29, 1  ;;  %771 = vmatprep.subr.mxu1 %v832_v3  ;;  %v317_v55 = vld [vmem:[%s1141_s6 + $0x50] sm:$0xff]  ;;  %v316_v56 = vld [vmem:[%s1141_s6 + $0x48] sm:$0xff]  ;;  %v315_v57 = vld [vmem:[%s1141_s6 + $0x40] sm:$0xff] }
   0xf   :  { %108 = vmatpush1.msra.mxu0 %v64_v15  ;;  %v41_v35 = vrot.slane %v40_v31, 1  ;;  %772 = vmatpush3.msra.mxu1 %v321_v51  ;;  %v314_v58 = vld [vmem:[%s1141_s6 + $0x38] sm:$0xff]  ;;  %v313_v59 = vld [vmem:[%s1141_s6 + $0x30] sm:$0xff]  ;;  %v312_v60 = vld [vmem:[%s1141_s6 + $0x28] sm:$0xff] }
  0x10   :  { %109 = vmatprep.subr.mxu0 %v63_v18  ;;  %v36_v38 = vadd.f32 %v35_v33, %v34_v29  ;;  %773 = vmatprep.subr.mxu1 %v832_v3  ;;  %v311_v61 = vld [vmem:[%s1141_s6 + $0x20] sm:$0xff]  ;;  %v310_v62 = vld [vmem:[%s1141_s6 + $0x18] sm:$0xff]  ;;  %v309_v63 = vld [vmem:[%s1141_s6 + $0x10] sm:$0xff] }
  0x11   :  { %110 = vmatpush1.msra.mxu0 %v62_v20  ;;  %v42_v39 = vadd.f32 %v41_v35, %v40_v31  ;;  %774 = vmatpush3.msra.mxu1 %v320_v52  ;;  %v308_v0 = vld [vmem:[%s1141_s6 + $0x8] sm:$0xff]  ;;  %v307_v1 = vld [vmem:[%s1141_s6] sm:$0xff] }
  0x12   :  { %111 = vmatprep.subr.mxu0 %v61_v22  ;;  %v44_v44 = vmul.f32 0.125, %v36_v38  ;;  %775 = vmatprep.subr.mxu1 %v832_v3  ;;  %v78_v6 = vld [vmem:[%s1142_s5] sm:$0x3]  ;;  %v247_v13 = vld [vmem:[%s1143_s1 + $0x4] sm:$0xf] }
  0x13   :  { %112 = vmatpush1.msra.mxu0 %v60_v24  ;;  %v45_v45 = vmul.f32 0.125, %v42_v39  ;;  %776 = vmatpush3.msra.mxu1 %v319_v53  ;;  %v87_v7 = vrot.slane %v78_v6, %v86_v5  ;;  %v246_v12 = vld [vmem:[%s1143_s1] sm:$0xf]  ;;  %v248_v14 = vld [vmem:[%s1143_s1 + $0x8] sm:$0xf]  ;;  %v258_v16 = vsel %vm250_vm2, %v247_v13, 0.0 }
  0x14   :  { %113 = vmatprep.subr.mxu0 %v59_v26  ;;  %777 = vmatprep.subr.mxu1 %v832_v3  ;;  %v251_v15 = vsel %vm250_vm2, %v246_v12, 0.0  ;;  %v265_v19 = vsel %vm250_vm2, %v248_v14, 0.0  ;;  %v259_v21 = vrot.slane %v258_v16, 4  ;;  %v249_v22 = vld [vmem:[%s1143_s1 + $0xc] sm:$0xf]  ;;  %v1077_v24 = vsub.s32 0, %v1055_v4 }
  0x15   :  { %114 = vmatpush1.msra.mxu0 %v58_v28  ;;  %v93_v49 = vsel %vm92_vm0, %v45_v45, %v44_v44  ;;  %778 = vmatpush3.msra.mxu1 %v318_v54  ;;  %v252_v20 = vrot.slane %v251_v15, 4  ;;  %v266_v23 = vrot.slane %v265_v19, 4  ;;  %v176_v26 = vunpack.c.l.s4 %v834_v25 }
  0x16   :  { %115 = vmatprep.subr.mxu0 %v57_v30  ;;  %779 = vmatprep.subr.mxu1 %v832_v3  ;;  %v272_v27 = vsel %vm250_vm2, %v249_v22, 0.0  ;;  %v260_v29 = vadd.f32 %v259_v21, %v258_v16 }
  0x17   :  { %116 = vmatpush1.msra.mxu0 %v56_v32  ;;  %780 = vmatpush3.msra.mxu1 %v317_v55  ;;  %v253_v28 = vadd.f32 %v252_v20, %v251_v15  ;;  %v267_v30 = vadd.f32 %v266_v23, %v265_v19  ;;  %v273_v31 = vrot.slane %v272_v27, 4  ;;  %v83_v32 = vrot.slane %v78_v6, %v1077_v24 }
  0x18   :  { %117 = vmatprep.subr.mxu0 %v55_v34  ;;  %781 = vmatprep.subr.mxu1 %v832_v3  ;;  %v177_v33 = vunpack.c.0.s8 %v176_v26  ;;  %v261_v35 = vrot.slane %v260_v29, 2 }
  0x19   :  { %118 = vmatpush1.msra.mxu0 %v54_v36  ;;  %782 = vmatpush3.msra.mxu1 %v316_v56  ;;  %v254_v34 = vrot.slane %v253_v28, 2  ;;  %v268_v36 = vrot.slane %v267_v30, 2 }
  0x1a   :  { %119 = vmatprep.subr.mxu0 %v53_v37  ;;  %783 = vmatprep.subr.mxu1 %v832_v3  ;;  %v274_v37 = vadd.f32 %v273_v31, %v272_v27  ;;  %v1082_v39 = vsub.s32 %v177_v33, %v1055_v4 }
  0x1b   :  { %120 = vmatpush1.msra.mxu0 %v52_v40  ;;  %784 = vmatpush3.msra.mxu1 %v315_v57  ;;  %v255_v40 = vadd.f32 %v254_v34, %v253_v28 }
  0x1c   :  { %121 = vmatprep.subr.mxu0 %v51_v41  ;;  %785 = vmatprep.subr.mxu1 %v832_v3  ;;  %v262_v41 = vadd.f32 %v261_v35, %v260_v29  ;;  %v275_v44 = vrot.slane %v274_v37, 2 }
  0x1d   :  { %122 = vmatpush1.msra.mxu0 %v50_v42  ;;  %786 = vmatpush3.msra.mxu1 %v314_v58  ;;  %v835_v58 = vmov 1983009808  }
  0x1e   :  { %123 = vmatprep.subr.mxu0 %v49_v43  ;;  %787 = vmatprep.subr.mxu1 %v832_v3  ;;  %v269_v43 = vadd.f32 %v268_v36, %v267_v30  ;;  %v276_v51 = vadd.f32 %v275_v44, %v274_v37  ;;  %v451_v44 = vld [vmem:[%s1146_s3] sm:$0xff] }
  0x1f   :  { %124 = vmatpush1.msra.mxu0 %v48_v46  ;;  %788 = vmatpush3.msra.mxu1 %v313_v59  ;;  %v298_v59 = vunpack.c.l.s4 %v835_v58 }
  0x20   :  { %125 = vmatprep.subr.mxu0 %v47_v47  ;;  %789 = vmatprep.subr.mxu1 %v832_v3  ;;  %v256_v47 = vrot.slane %v255_v40, 1  ;;  %v270_v50 = vrot.slane %v269_v43, 1 }
  0x21   :  { %126 = vmatpush1.msra.mxu0 %v46_v48  ;;  %790 = vmatpush3.msra.mxu1 %v312_v60  ;;  %v263_v48 = vrot.slane %v262_v41, 1  ;;  %v220_v60 = vld [vmem:[%s1144_s2] sm:$0x3] }
  0x22   :  { %160 = vmatmul.mubr.f32.vlgmr.msra.gmra.mxu0 %v93_v49  ;;  %804 = vmatprep.subr.mxu0 %v832_v3  ;;  %v257_v54 = vadd.f32 %v256_v47, %v255_v40  ;;  %v452_v47 = vld [vmem:[%s1146_s3 + $0x8] sm:$0xff] }
  0x23   :  { %806 = vmatprep.mubr.msk.f32.mxu0 %vm833_vm1, %v832_v3  ;;  %791 = vmatprep.subr.mxu1 %v832_v3  ;;  %v264_v55 = vadd.f32 %v263_v48, %v262_v41 }
  0x24   :  { %792 = vmatpush3.msra.mxu1 %v311_v61  ;;  %v271_v61 = vadd.f32 %v270_v50, %v269_v43  ;;  %v280_v5 = vmul.f32 0.25, %v257_v54 }
  0x25   :  { %793 = vmatprep.subr.mxu1 %v832_v3  ;;  %v281_v6 = vmul.f32 0.25, %v264_v55 }
  0x26   :  { %794 = vmatpush3.msra.mxu1 %v310_v62  ;;  %v277_v62 = vrot.slane %v276_v51, 1  ;;  %v282_v15 = vmul.f32 0.25, %v271_v61 }
  0x27   :  { %795 = vmatprep.subr.mxu1 %v832_v3  ;;  %v288_v16 = vsel %vm92_vm0, %v281_v6, %v280_v5 }
  0x28   :  { %796 = vmatpush3.msra.mxu1 %v309_v63  ;;  %v290_v21 = vsel %vm289_vm3, %v282_v15, %v288_v16 }
  0x29   :  { %797 = vmatprep.subr.mxu1 %v832_v3 }
  0x2a   :  { %798 = vmatpush3.msra.mxu1 %v308_v0 }
  0x2b   :  { %799 = vmatprep.subr.mxu1 %v832_v3 }
  0x2c   :  { %800 = vmatpush3.msra.mxu1 %v307_v1 }
  0x2d   :  { %809 = vmatprep.subr.mxu1 %v832_v3 }
  0xe2   :  { %v161_v8 = vpop.f32.mrf.mxu0 }
  0xe3   :  { %v162_v38 = vadd.f32 %v161_v8, %v83_v32 }
  0xe4   :  { %v163_v9 = vpop.f32.mrf.mxu0 }
  0xe5   :  { %v164_v10 = vadd.f32 %v163_v9, %v87_v7  ;;  %v181_v45 = vrot.slane %v162_v38, %v1082_v39  ;;  %v221_v7 = vld [vmem:[%s1144_s2 + $0x2] sm:$0x3] }
  0xe7   :  { %v742_v11 = vmul.f32 -1.442695, %v164_v10  ;;  %v182_v52 = vcombine.high %v181_v45, %v181_v45  ;;  %v189_v63 = vrot.slane %v181_v45, %v1082_v39  ;;  %v299_v10 = vunpack.c.0.s8 %v298_v59 }
  0xe9   :  { %828 = vpow2.f32 %v742_v11  ;;  %v196_v0 = vrot.slane %v182_v52, %v1082_v39  ;;  %v278_v11 = vadd.f32 %v277_v62, %v276_v51  ;;  %v237_v12 = vrot.slane %v189_v63, %v1077_v24 }
  0xea   :  { %v302_v19 = vsub.s32 %v299_v10, %v1055_v4  ;;  %v743_v4 = vld [vmem:[%s1145_s7] ss:$0 sm:$0xff] }
  0xeb   :  { %v241_v13 = vrot.slane %v196_v0, %v1077_v24  ;;  %v283_v20 = vmul.f32 0.25, %v278_v11 }
  0xed   :  { %v292_v25 = vsel %vm291_vm4, %v283_v20, %v290_v21 }
  0xf6   :  { %v829_v17 = vpop.eup %828 }
  0xf7   :  { %v169_v18 = vadd.f32 1.0, %v829_v17 }
  0xf9   :  { %830 = vrcp.f32 %v169_v18 }
 0x106   :  { %v831_v42 = vpop.eup %830 }
 0x107   :  { %v172_v46 = vmul.f32 0.9, %v831_v42 }
 0x109   :  { %v173_v49 = vadd.f32 0.1, %v172_v46 }
 0x10b   :  { %v204_v53 = vrot.slane %v173_v49, %v1082_v39 }
 0x10d   :  { %v205_v56 = vcombine.high %v204_v53, %v204_v53  ;;  %v212_v57 = vrot.slane %v204_v53, %v1082_v39 }
 0x10f   :  { %v219_v1 = vrot.slane %v205_v56, %v1082_v39  ;;  %v225_v2 = vrot.slane %v212_v57, %v1077_v24 }
 0x111   :  { %v229_v8 = vrot.slane %v219_v1, %v1077_v24  ;;  %v232_v9 = vmul.f32 %v225_v2, %v220_v60 }
 0x113   :  { %v233_v14 = vmul.f32 %v229_v8, %v221_v7  ;;  %v244_v17 = vadd.f32 %v237_v12, %v232_v9 }
 0x115   :  { %v245_v18 = vadd.f32 %v241_v13, %v233_v14 }
 0x117   :  { %v296_v22 = vcombine.low %v244_v17, %v245_v18 }
 0x119   :  { %v303_v23 = vrot.slane %v296_v22, %v302_v19 }
 0x11b   :  { %v304_v26 = vcombine.low %v303_v23, %v303_v23 }
 0x11d   :  { %v306_v27 = vsel %vm250_vm2, %v292_v25, %v304_v26 }
 0x11e   :  { %802 = vmatmul.mubr.f32.vlgmr.msra.gmra.mxu1 %v306_v27 }
 0x11f   :  { %811 = vmatprep.mubr.msk.f32.mxu1 %vm833_vm1, %v832_v3 }
 0x1de   :  { %v389_v28 = vpop.f32.mrf.mxu1 }
 0x1df   :  { %v402_v29 = vcombine.high %v389_v28, %v389_v28  ;;  %v400_v34 = vadd.f32 %v743_v4, %v389_v28 }
 0x1e0   :  { %v803_v30 = vpop.f32.mrf.mxu1 }
 0x1e1   :  { %v409_v31 = vrot.slane %v402_v29, %v1082_v39 }
 0x1e3   :  { %v410_v32 = vcombine.high %v409_v31, %v409_v31  ;;  %v417_v33 = vrot.slane %v409_v31, %v1082_v39 }
 0x1e5   :  { %v424_v35 = vrot.slane %v410_v32, %v1082_v39  ;;  %v425_v36 = vcombine.high %v417_v33, %v417_v33  ;;  %v430_v37 = vrot.slane %v417_v33, %v1077_v24 }
 0x1e7   :  { %v426_v38 = vcombine.high %v424_v35, %v424_v35  ;;  %v447_v40 = vadd.f32 %v430_v37, %v400_v34  ;;  %v434_v41 = vrot.slane %v424_v35, %v1077_v24  ;;  %v438_v42 = vrot.slane %v425_v36, %v1077_v24 }
 0x1e9   :  { %805 = vmatpush3.xpose.msra.mxu0 %v447_v40  ;;  %v448_v43 = vadd.f32 %v434_v41, %v400_v34  ;;  %v442_v45 = vrot.slane %v426_v38, %v1077_v24  ;;  %v449_v39 = vadd.f32 %v438_v42, %v400_v34 }
 0x1ea   :  { %814 = vmatprep.subr.mxu0 %v832_v3 }
 0x1eb   :  { %810 = vmatpush3.xpose.msra.mxu1 %v448_v43  ;;  %v450_v46 = vadd.f32 %v442_v45, %v400_v34 }
 0x1ec   :  { %807 = vmatmul.mubr.f32.vlgmr.msra.gmra.mxu0 %v451_v44  ;;  %819 = vmatprep.subr.mxu1 %v832_v3 }
 0x1ed   :  { %815 = vmatpush3.xpose.msra.mxu0 %v449_v39  ;;  %816 = vmatprep.mubr.msk.f32.mxu0 %vm833_vm1, %v832_v3 }
 0x1ee   :  { %812 = vmatmul.mubr.f32.vlgmr.msra.gmra.mxu1 %v451_v44 }
 0x1ef   :  { %820 = vmatpush3.xpose.msra.mxu1 %v450_v46  ;;  %821 = vmatprep.mubr.msk.f32.mxu1 %vm833_vm1, %v832_v3 }
 0x1f0   :  { %817 = vmatmul.mubr.f32.vlgmr.msra.gmra.mxu0 %v452_v47 }
 0x1f2   :  { %822 = vmatmul.mubr.f32.vlgmr.msra.gmra.mxu1 %v452_v47 }
 0x2ac   :  { %v519_v24 = vpop.f32.mrf.mxu0 }
 0x2ad   :  { %734 = vst.msk [vmem:[%s1147_s8] sm:$0xff] %vm733_vm5, %v519_v24 }
 0x2ae   :  { %v589_v48 = vpop.f32.mrf.mxu1  ;;  %v808_v49 = vpop.f32.mrf.mxu0 }
 0x2af   :  { %735 = vst.msk [vmem:[%s1147_s8 + $0x8] sm:$0xff] %vm733_vm5, %v589_v48 }
 0x2b0   :  { %v813_v50 = vpop.f32.mrf.mxu1  ;;  %v659_v51 = vpop.f32.mrf.mxu0 }
 0x2b1   :  { %736 = vst.msk [vmem:[%s1147_s8 + $0x10] sm:$0xff] %vm733_vm5, %v659_v51 }
 0x2b2   :  { %v729_v3 = vpop.f32.mrf.mxu1  ;;  %v818_v52 = vpop.f32.mrf.mxu0 }
 0x2b3   :  { %737 = vst.msk [vmem:[%s1147_s8 + $0x18] sm:$0xff] %vm733_vm5, %v729_v3 }
 0x2b4   :  { %v823_v53 = vpop.f32.mrf.mxu1 }

</bundles_post_ra>
